<compile_context>
chip_gen: v7x
topology: tpu7x:2x2x1
jax: 0.10.0
libtpu: 0.0.40
codegen_flags: <defaults>
</compile_context>

<pallas_src>
import math

import jax
import jax.numpy as jnp
from jax.experimental import pallas as pl
from jax.experimental.pallas import tpu as pltpu


def _round_up(x, m):
    return ((x + m - 1) // m) * m


def _lcm(a, b):
    return a * b // math.gcd(a, b)


def gnn_kernel(a_ref, xw_ref, b_ref, p_ref, out_ref, h_acc_ref):
    """One (row-tile i, K-tile k) step of relu(A_hat @ XW + b) followed by P @ h."""
    k = pl.program_id(1)

    # Start of a new row tile: zero the f32 h accumulator.
    @pl.when(k == 0)
    def _init():
        h_acc_ref[...] = jnp.zeros_like(h_acc_ref)

    # Accumulate this K slice of the adjacency contraction (bf16 MXU, f32 accumulation).
    h_acc_ref[...] += jnp.dot(a_ref[...], xw_ref[...],
                              preferred_element_type=jnp.float32)

    # Last K step: bias + ReLU (f32), then this row tile's mean-pool contribution.
    @pl.when(k == pl.num_programs(1) - 1)
    def _final():
        h = jnp.maximum(h_acc_ref[...] + b_ref[...], 0.0)
        out_ref[...] = jnp.dot(p_ref[...], h.astype(p_ref.dtype),
                               preferred_element_type=jnp.float32)


def gnn_forward(a_hat, x, w, b, pool_mat, w_head, b_head, *, tm=512, tk=512):
    N, F_in = x.shape
    H = w.shape[1]
    B = pool_mat.shape[0]
    C = w_head.shape[1]

    # X @ W hoisted out of the kernel (f32 GEMM in XLA, cast to bf16 for the MXU stream).
    xw = jnp.dot(x, w)

    # Tile / padding geometry: TM/TK multiples of 128 (clamped to the padded node count so
    # small graphs run as a single grid step), feature/batch dims padded for lanes/sublanes.
    n128 = _round_up(N, 128)
    tm = _round_up(max(128, min(tm, n128)), 128)
    tk = _round_up(max(128, min(tk, n128)), 128)
    n_pad = _round_up(N, _lcm(tm, tk))
    h_pad = _round_up(H, 128)
    b_pad = _round_up(B, 8)
    n_rows = n_pad // tm
    n_k = n_pad // tk
    grid = (n_rows, n_k)

    def pad2(arr, rows, cols, dtype):
        return jnp.pad(arr, ((0, rows - arr.shape[0]),
                             (0, cols - arr.shape[1]))).astype(dtype)

    a_p = pad2(a_hat, n_pad, n_pad, jnp.bfloat16)
    xw_p = pad2(xw, n_pad, h_pad, jnp.bfloat16)
    b_p = pad2(b, 1, h_pad, jnp.float32)
    p_p = pad2(pool_mat, b_pad, n_pad, jnp.bfloat16)

    # VMEM budget: x2 only for the double-buffered streamed tiles; resident/scratch once.
    bf16, f32 = 2, 4
    streamed = 2 * (tm * tk * bf16          # A tile
                    + tk * h_pad * bf16     # XW tile
                    + b_pad * tm * bf16     # P tile
                    + b_pad * h_pad * f32)  # partial pooled output block
    resident = 8 * h_pad * f32              # bias (sublane padded)
    scratch = tm * h_pad * f32              # h accumulator
    vmem_limit = min(max(streamed + resident + scratch + (2 << 20), 16 << 20), 48 << 20)

    cost = pl.CostEstimate(
        flops=2 * (n_pad * n_pad * h_pad + b_pad * n_pad * h_pad),
        transcendentals=0,
        bytes_accessed=(a_p.size + n_rows * xw_p.size + p_p.size) * bf16
                       + (b_p.size + n_rows * b_pad * h_pad) * f32,
    )

    partial = pl.pallas_call(
        gnn_kernel,
        out_shape=jax.ShapeDtypeStruct((n_rows, b_pad, h_pad), jnp.float32),
        grid_spec=pltpu.PrefetchScalarGridSpec(
            num_scalar_prefetch=0,
            grid=grid,
            in_specs=[
                pl.BlockSpec((tm, tk), lambda i, k: (i, k)),       # A_hat tile (streamed)
                pl.BlockSpec((tk, h_pad), lambda i, k: (k, 0)),    # XW K-slice (streamed)
                pl.BlockSpec((1, h_pad), lambda i, k: (0, 0)),     # bias (resident)
                pl.BlockSpec((b_pad, tm), lambda i, k: (0, i)),    # P column tile
            ],
            out_specs=pl.BlockSpec((None, b_pad, h_pad), lambda i, k: (i, 0, 0)),
            scratch_shapes=[
                pltpu.VMEM((tm, h_pad), jnp.float32),  # h accumulator (per row tile)
            ],
        ),
        compiler_params=pltpu.CompilerParams(
            # Row tiles are independent (per-tile partial pooled output) -> "parallel"
            # (megacore-shardable on v7x); K is the reduction carry -> "arbitrary".
            dimension_semantics=("parallel", "arbitrary"),
            vmem_limit_bytes=vmem_limit,
        ),
        cost_estimate=cost,
    )(a_p, xw_p, b_p, p_p)

    # Sum per-row-tile partial pooled contributions and apply the head, all in f32.
    pooled = jnp.sum(partial, axis=0)[:B, :H]
    return pooled @ w_head + b_head


def build_normalized_adjacency(edge_index, edge_weight, num_nodes):
    """Dense D^-1/2 (A + I) D^-1/2 from COO edges (plain-JAX glue)."""
    src, dst = edge_index[0], edge_index[1]
    adj = jnp.zeros((num_nodes, num_nodes), jnp.float32)
    # GCNConv aggregates messages at the destination node: row = dst, col = src.
    adj = adj.at[dst, src].add(edge_weight)
    adj = adj + jnp.eye(num_nodes, dtype=jnp.float32)  # self-loops
    deg = jnp.sum(adj, axis=1)
    d_inv_sqrt = jnp.where(deg > 0, 1.0 / jnp.sqrt(deg), 0.0)
    return adj * d_inv_sqrt[:, None] * d_inv_sqrt[None, :]


def build_mean_pool_matrix(batch, num_graphs, num_nodes):
    """P[g, i] = 1/|graph g| if node i belongs to graph g else 0."""
    onehot = (batch[None, :] == jnp.arange(num_graphs)[:, None]).astype(jnp.float32)
    counts = jnp.maximum(jnp.sum(onehot, axis=1, keepdims=True), 1.0)
    return onehot / counts


def reference_forward(a_hat, x, w, b, pool_mat, w_head, b_head):
    h = jnp.maximum(a_hat @ (x @ w) + b, 0.0)
    return pool_mat @ h @ w_head + b_head


if __name__ == "__main__":
    key = jax.random.PRNGKey(0)
    k_x, k_e, k_w, k_gw, k_gb, k_hw, k_hb = jax.random.split(key, 7)

    # Small synthetic graph batch: 3 graphs, 300 nodes total, 1200 directed edges.
    N, F_IN, HID, B, C, E = 300, 16, 32, 3, 8, 1200

    x = jax.random.normal(k_x, (N, F_IN), jnp.float32)
    edge_index = jax.random.randint(k_e, (2, E), 0, N, jnp.int32)
    edge_weight = jax.random.uniform(k_w, (E,), jnp.float32, 0.5, 1.5)
    batch = jnp.concatenate([
        jnp.zeros((100,), jnp.int32),
        jnp.ones((100,), jnp.int32),
        jnp.full((N - 200,), 2, jnp.int32),
    ])

    # Deterministic parameter init (GCNConv weight/bias, head weight/bias).
    w_gcn = jax.random.normal(k_gw, (F_IN, HID), jnp.float32) * (1.0 / jnp.sqrt(F_IN))
    b_gcn = jax.random.normal(k_gb, (1, HID), jnp.float32) * 0.01
    w_head = jax.random.normal(k_hw, (HID, C), jnp.float32) * (1.0 / jnp.sqrt(HID))
    b_head = jax.random.normal(k_hb, (1, C), jnp.float32) * 0.01

    a_hat = build_normalized_adjacency(edge_index, edge_weight, N)
    pool_mat = build_mean_pool_matrix(batch, B, N)

    # Small demo graph -> tiles clamp to 384, single grid step (perf-review recommendation).
    out = gnn_forward(a_hat, x, w_gcn, b_gcn, pool_mat, w_head, b_head)
    out = jax.block_until_ready(out)

    ref = reference_forward(a_hat, x, w_gcn, b_gcn, pool_mat, w_head, b_head)
    assert out.shape == (B, C)
    # bf16 MXU inputs with f32 accumulation and an all-f32 pooled/head path.
    assert jnp.allclose(out, ref, atol=3e-2, rtol=3e-2), jnp.max(jnp.abs(out - ref))

    print("KERNEL_OK")
</pallas_src>

<mosaic_0001>
module attributes {stable_mosaic.version = 11 : i64} {
  func.func @gnn_kernel(%arg0: i32, %arg1: i32, %arg2: memref<384x384xbf16, #tpu.memory_space<vmem>>, %arg3: memref<384x128xbf16, #tpu.memory_space<vmem>>, %arg4: memref<1x128xf32, #tpu.memory_space<vmem>>, %arg5: memref<8x384xbf16, #tpu.memory_space<vmem>>, %arg6: memref<1x8x128xf32, #tpu.memory_space<vmem>>, %arg7: memref<384x128xf32, #tpu.memory_space<vmem>>) attributes {dimension_semantics = [#tpu.dimension_semantics<parallel>, #tpu.dimension_semantics<arbitrary>], iteration_bounds = array<i64: 1, 1>, scalar_prefetch = 0 : i64, scratch_operands = 1 : i64, tpu.core_type = #tpu.core_type<tc>, window_params = [{transform_indices = @transform_0, window_bounds = array<i64: 384, 384>}, {transform_indices = @transform_1, window_bounds = array<i64: 384, 128>}, {pipeline_mode = #tpu.pipeline_mode<synchronous>, transform_indices = @transform_2, window_bounds = array<i64: 1, 128>}, {transform_indices = @transform_3, window_bounds = array<i64: 8, 384>}, {transform_indices = @transform_4, window_bounds = array<i64: 1, 8, 128>}]} {
    %c0_i32 = arith.constant 0 : i32
    %0 = arith.cmpi eq, %arg1, %c0_i32 : i32
    %1 = arith.extui %0 : i1 to i32
    %c0_i32_0 = arith.constant 0 : i32
    %2 = arith.cmpi ne, %1, %c0_i32_0 : i32
    scf.if %2 {
      %cst_10 = arith.constant 0.000000e+00 : f32
      %12 = vector.broadcast %cst_10 : f32 to vector<384x128xf32>
      %c0_11 = arith.constant 0 : index
      %c0_12 = arith.constant 0 : index
      %13 = vector.load %arg7[%c0_11, %c0_12] : memref<384x128xf32, #tpu.memory_space<vmem>>, vector<384x128xf32>
      tpu.vector_store %arg7[%c0_11, %c0_12], %12 {strides = array<i32>} : memref<384x128xf32, #tpu.memory_space<vmem>>, vector<384x128xf32>,
    } else {
    }
    %c0 = arith.constant 0 : index
    %c0_1 = arith.constant 0 : index
    %3 = vector.load %arg7[%c0, %c0_1] : memref<384x128xf32, #tpu.memory_space<vmem>>, vector<384x128xf32>
    %c0_2 = arith.constant 0 : index
    %c0_3 = arith.constant 0 : index
    %4 = vector.load %arg2[%c0_2, %c0_3] : memref<384x384xbf16, #tpu.memory_space<vmem>>, vector<384x384xbf16>
    %c0_4 = arith.constant 0 : index
    %c0_5 = arith.constant 0 : index
    %5 = vector.load %arg3[%c0_4, %c0_5] : memref<384x128xbf16, #tpu.memory_space<vmem>>, vector<384x128xbf16>
    %cst = arith.constant dense<0.000000e+00> : vector<384x128xf32>
    %6 = tpu.matmul %4, %5, %cst {dimension_numbers = #tpu.dot_dimension_numbers<[1], [0], [0], [1], [0, 0, 1, 1], [], []>} : vector<384x384xbf16>, vector<384x128xbf16>, vector<384x128xf32> -> vector<384x128xf32>
    %7 = arith.addf %3, %6 : vector<384x128xf32>
    %c0_6 = arith.constant 0 : index
    %c0_7 = arith.constant 0 : index
    %8 = vector.load %arg7[%c0_6, %c0_7] : memref<384x128xf32, #tpu.memory_space<vmem>>, vector<384x128xf32>
    tpu.vector_store %arg7[%c0_6, %c0_7], %7 {strides = array<i32>} : memref<384x128xf32, #tpu.memory_space<vmem>>, vector<384x128xf32>,
    %c0_i32_8 = arith.constant 0 : i32
    %9 = arith.cmpi eq, %arg1, %c0_i32_8 : i32
    %10 = arith.extui %9 : i1 to i32
    %c0_i32_9 = arith.constant 0 : i32
    %11 = arith.cmpi ne, %10, %c0_i32_9 : i32
    scf.if %11 {
      %c0_10 = arith.constant 0 : index
      %c0_11 = arith.constant 0 : index
      %12 = vector.load %arg7[%c0_10, %c0_11] : memref<384x128xf32, #tpu.memory_space<vmem>>, vector<384x128xf32>
      %c0_12 = arith.constant 0 : index
      %c0_13 = arith.constant 0 : index
      %13 = vector.load %arg4[%c0_12, %c0_13] : memref<1x128xf32, #tpu.memory_space<vmem>>, vector<1x128xf32>
      %14 = vector.broadcast %13 : vector<1x128xf32> to vector<384x128xf32>
      %15 = arith.addf %12, %14 : vector<384x128xf32>
      %cst_14 = arith.constant 0.000000e+00 : f32
      %16 = vector.broadcast %cst_14 : f32 to vector<384x128xf32>
      %17 = arith.maximumf %15, %16 : vector<384x128xf32>
      %c0_15 = arith.constant 0 : index
      %c0_16 = arith.constant 0 : index
      %18 = vector.load %arg5[%c0_15, %c0_16] : memref<8x384xbf16, #tpu.memory_space<vmem>>, vector<8x384xbf16>
      %19 = arith.truncf %17 : vector<384x128xf32> to vector<384x128xbf16>
      %cst_17 = arith.constant dense<0.000000e+00> : vector<8x128xf32>
      %20 = tpu.matmul %18, %19, %cst_17 {dimension_numbers = #tpu.dot_dimension_numbers<[1], [0], [0], [1], [0, 0, 1, 1], [], []>} : vector<8x384xbf16>, vector<384x128xbf16>, vector<8x128xf32> -> vector<8x128xf32>
      %c0_18 = arith.constant 0 : index
      %c0_19 = arith.constant 0 : index
      %c0_20 = arith.constant 0 : index
      %21 = vector.load %arg6[%c0_18, %c0_19, %c0_20] : memref<1x8x128xf32, #tpu.memory_space<vmem>>, vector<1x8x128xf32>
      %22 = vector.shape_cast %21 : vector<1x8x128xf32> to vector<8x128xf32>
      %23 = vector.shape_cast %20 : vector<8x128xf32> to vector<1x8x128xf32>
      tpu.vector_store %arg6[%c0_18, %c0_19, %c0_20], %23 {strides = array<i32>} : memref<1x8x128xf32, #tpu.memory_space<vmem>>, vector<1x8x128xf32>,
    } else {
    }
    return
  }
  func.func @transform_0(%arg0: i32, %arg1: i32) -> (i32, i32) {
    %c0_i32 = arith.constant 0 : i32
    return %arg0, %arg1 : i32, i32
  }
  func.func @transform_1(%arg0: i32, %arg1: i32) -> (i32, i32) {
    %c0_i32 = arith.constant 0 : i32
    %c0_i32_0 = arith.constant 0 : i32
    return %arg1, %c0_i32 : i32, i32
  }
  func.func @transform_2(%arg0: i32, %arg1: i32) -> (i32, i32) {
    %c0_i32 = arith.constant 0 : i32
    %c0_i32_0 = arith.constant 0 : i32
    %c0_i32_1 = arith.constant 0 : i32
    return %c0_i32, %c0_i32_0 : i32, i32
  }
  func.func @transform_3(%arg0: i32, %arg1: i32) -> (i32, i32) {
    %c0_i32 = arith.constant 0 : i32
    %c0_i32_0 = arith.constant 0 : i32
    return %c0_i32, %arg0 : i32, i32
  }
  func.func @transform_4(%arg0: i32, %arg1: i32) -> (i32, i32, i32) {
    %c0_i32 = arith.constant 0 : i32
    %c0_i32_0 = arith.constant 0 : i32
    %c0_i32_1 = arith.constant 0 : i32
    return %arg0, %c0_i32, %c0_i32_0 : i32, i32, i32
  }
}

</mosaic_0001>

<bundles_post_ra>
// kernel: tpu_custom_call.1
= control target key start
LH: loop header
LB: loop body
LE: loop exit
PB: predicated region body
PF: predicated region fallthrough
CT: control target
= control target key end

     0   :  { %9 = vsyncpa [#allocation4], 0  ;;  %s2451_s0 = inlined_call_operand.hbm [shape: bf16[384,384], index: 0, kind: input, shape index: {}]   ;;  %s2452_s1 = inlined_call_operand.hbm [shape: bf16[384,128], index: 1, kind: input, shape index: {}]   ;;  %s2453_s2 = inlined_call_operand.vmem [shape: f32[1,128], index: 2, kind: input, shape index: {}]   ;;  %s2454_s3 = inlined_call_operand.hbm [shape: bf16[8,384], index: 3, kind: input, shape index: {}]   ;;  %s2455_s4 = inlined_call_operand.hbm [shape: f32[1,8,128], index: 4, kind: output, shape index: {}]  }
   0x1   :  { %10 = vsyncpa [#allocation7], 0 }
   0x2   :  { %11 = vsyncpa [#allocation5], 0  ;;  %s2139_s15 = smov [#allocation6]   ;;  %s2045_s19 = scalar_lea.hbm %s2452_s1, 3072 }
   0x3   :  { %s29_s16 = sshll.u32 %s2139_s15, 4  ;;  %p2046_p0 = scmp.ne.s32.totalorder %s2452_s1, %s2045_s19  ;;  %s30_s16 = int_to_ptr.vmem [resolvable:$true] %s29_s16 }
   0x4   :  { %p2049_p1 = scmp.lt.u32.totalorder %s2045_s19, %s2452_s1 }
   0x6   :  { %p2051_p2 = pnand %p2049_p1, %p2046_p0 }
   0x8   :  { %2054 = shalt.err (!%p2051_p2)
}
   0x9   :  { %s2055_s24 = scalar_lea.vmem %s30_s16, 3072  ;;  %p2060_p4 = scmp.lt.s32.totalorder %s30_s16, %s30_s16 }
   0xa   :  { %p2056_p3 = scmp.ne.s32.totalorder %s30_s16, %s2055_s24  ;;  %p2061_p5 = scmp.lt.s32.totalorder %s2055_s24, %s2055_s24 }
   0xc   :  { %p2062_p6 = por %p2061_p5, %p2060_p4 }
   0xe   :  { %p2063_p7 = pnand %p2062_p6, %p2056_p3 }
  0x10   :  { %2066 = shalt.err (!%p2063_p7)
}
  0x11   :  { %s2140_s25 = smov 64   ;;  %s2141_s26 = smov 4  }
  0x12   :  { %35 = dma.hbm_to_vmem [thread:$0]  %s2452_s1, 3072, %s30_s16, [#allocation7], %s2140_s25, %s2140_s25, %s2141_s26  }
  0x13   :  { %s2142_s29 = smov [#allocation3]   ;;  %s2067_s7 = scalar_lea.hbm %s2451_s0, 9216 }
  0x14   :  { %s17_s30 = sshll.u32 %s2142_s29, 4  ;;  %p2068_p8 = scmp.ne.s32.totalorder %s2451_s0, %s2067_s7  ;;  %s18_s30 = int_to_ptr.vmem [resolvable:$true] %s17_s30 }
  0x15   :  { %p2071_p9 = scmp.lt.u32.totalorder %s2067_s7, %s2451_s0 }
  0x17   :  { %p2073_p10 = pnand %p2071_p9, %p2068_p8 }
  0x19   :  { %2076 = shalt.err (!%p2073_p10)
}
  0x1a   :  { %s2077_s12 = scalar_lea.vmem %s18_s30, 9216  ;;  %p2082_p12 = scmp.lt.s32.totalorder %s18_s30, %s18_s30 }
  0x1b   :  { %p2078_p11 = scmp.ne.s32.totalorder %s18_s30, %s2077_s12  ;;  %p2083_p13 = scmp.lt.s32.totalorder %s2077_s12, %s2077_s12 }
  0x1d   :  { %p2084_p0 = por %p2083_p13, %p2082_p12 }
  0x1f   :  { %p2085_p1 = pnand %p2084_p0, %p2078_p11 }
  0x21   :  { %2088 = shalt.err (!%p2085_p1)
}
  0x22   :  { %s2143_s1 = smov 192   ;;  %s2144_s13 = smov 12  }
  0x23   :  { %23 = dma.hbm_to_vmem [thread:$0]  %s2451_s0, 9216, %s18_s30, [#allocation4], %s2143_s1, %s2143_s1, %s2144_s13  }
  0x24   :  { %s2145_s16 = smov [#allocation8]   ;;  %s2089_s20 = scalar_lea.hbm %s2454_s3, 192 }
  0x25   :  { %s44_s17 = sshll.u32 %s2145_s16, 4  ;;  %p2090_p2 = scmp.ne.s32.totalorder %s2454_s3, %s2089_s20  ;;  %s45_s17 = int_to_ptr.vmem [resolvable:$true] %s44_s17 }
  0x26   :  { %p2093_p3 = scmp.lt.u32.totalorder %s2089_s20, %s2454_s3 }
  0x28   :  { %p2095_p4 = pnand %p2093_p3, %p2090_p2 }
  0x2a   :  { %2098 = shalt.err (!%p2095_p4)
}
  0x2b   :  { %s2099_s25 = scalar_lea.vmem %s45_s17, 192  ;;  %p2104_p6 = scmp.lt.s32.totalorder %s45_s17, %s45_s17 }
  0x2c   :  { %p2100_p5 = scmp.ne.s32.totalorder %s45_s17, %s2099_s25  ;;  %p2105_p7 = scmp.lt.s32.totalorder %s2099_s25, %s2099_s25 }
  0x2e   :  { %p2106_p8 = por %p2105_p7, %p2104_p6 }
  0x30   :  { %p2107_p9 = pnand %p2106_p8, %p2100_p5 }
  0x32   :  { %2110 = shalt.err (!%p2107_p9)
}
  0x33   :  { %47 = dma.hbm_to_vmem [thread:$0]  %s2454_s3, 192, %s45_s17, [#allocation7]  }
  0x34   :  { %2133 = dma.done.wait [#allocation4], 9216  }
  0x35   :  { %2134 = vsyncadd [#allocation4], 4294958080 }
  0x36   :  { %2135 = dma.done.wait [#allocation7], 3264  }
  0x37   :  { %2136 = vsyncadd [#allocation7], 4294964032  ;;  %v2146_v0 = vmov 0   ;;  %v1922_v1 = vld [vmem:[#allocation6] sm:$0xff]   ;;  %v1923_v2 = vld [vmem:[#allocation6 + $0x8] sm:$0xff]   ;;  %vm2148_vm0 = vmmov 0  }
  0x38   :  { %830 = vmatprep.subr.bf16.mxu0 %v2146_v0  ;;  %v1924_v3 = vld [vmem:[#allocation6 + $0x10] sm:$0xff]   ;;  %v1930_v4 = vld [vmem:[#allocation6 + $0x80] sm:$0xff]   ;;  %v1925_v5 = vld [vmem:[#allocation6 + $0x18] sm:$0xff]  }
  0x39   :  { %831 = vmatpush1.bf16.msra.mxu0 %v1922_v1  ;;  %1827 = vmatprep.subr.bf16.mxu1 %v1930_v4  ;;  %v1932_v6 = vld [vmem:[#allocation6 + $0x88] sm:$0xff]   ;;  %v1934_v7 = vld [vmem:[#allocation6 + $0x90] sm:$0xff]   ;;  %v1926_v8 = vld [vmem:[#allocation6 + $0x20] sm:$0xff]  }
  0x3a   :  { %832 = vmatprep.subr.bf16.mxu0 %v2146_v0  ;;  %1828 = vmatpush3.bf16.msra.mxu1 %v1930_v4  ;;  %v1936_v9 = vld [vmem:[#allocation6 + $0x98] sm:$0xff]   ;;  %v1927_v10 = vld [vmem:[#allocation6 + $0x28] sm:$0xff]   ;;  %v1938_v11 = vld [vmem:[#allocation6 + $0xa0] sm:$0xff]  }
  0x3b   :  { %1829 = vmatprep.subr.bf16.mxu1 %v1932_v6  ;;  %v1928_v12 = vld [vmem:[#allocation6 + $0x30] sm:$0xff]   ;;  %v1940_v13 = vld [vmem:[#allocation6 + $0xa8] sm:$0xff]   ;;  %v1929_v15 = vld [vmem:[#allocation6 + $0x38] sm:$0xff]  }
  0x3c   :  { %v1946_v14 = vld [vmem:[#allocation3 + $0x8] ss:$12 sps:$4 sm:$0xff]   ;;  %v1949_v16 = vld [vmem:[#allocation3 + $0x4] ss:$12 sps:$4 sm:$0xff]   ;;  %v1944_v19 = vld [vmem:[#allocation6 + $0xb8] sm:$0xff]  }
  0x3d   :  { %833 = vmatpush1.bf16.msra.mxu0 %v1923_v2  ;;  %1843 = vmatprep.mubr.bf16.mxu1 %v1946_v14  ;;  %v1942_v17 = vld [vmem:[#allocation6 + $0xb0] sm:$0xff]   ;;  %v1931_v18 = vld [vmem:[#allocation6 + $0x40] sm:$0xff]   ;;  %v1933_v20 = vld [vmem:[#allocation6 + $0x48] sm:$0xff]  }
  0x3e   :  { %834 = vmatprep.subr.bf16.mxu0 %v2146_v0  ;;  %1830 = vmatpush3.bf16.msra.mxu1 %v1932_v6  ;;  %v1935_v21 = vld [vmem:[#allocation6 + $0x50] sm:$0xff]   ;;  %v1950_v22 = vld [vmem:[#allocation3 + $0x20] ss:$12 sps:$4 sm:$0xff]   ;;  %v1954_v23 = vld [vmem:[#allocation3 + $0x38] ss:$12 sps:$4 sm:$0xff]  }
  0x3f   :  { %1831 = vmatprep.subr.bf16.mxu1 %v1934_v7  ;;  %862 = vmatprep.mubr.bf16.mxu0 %v1949_v16  ;;  %v1937_v24 = vld [vmem:[#allocation6 + $0x58] sm:$0xff]   ;;  %v1939_v25 = vld [vmem:[#allocation6 + $0x60] sm:$0xff]   ;;  %v1962_v27 = vld [vmem:[#allocation3 + $0x68] ss:$12 sps:$4 sm:$0xff]  }
  0x40   :  { %v1957_v26 = vld [vmem:[#allocation3 + $0x50] ss:$12 sps:$4 sm:$0xff]   ;;  %v1941_v28 = vld [vmem:[#allocation6 + $0x68] sm:$0xff]   ;;  %v1970_v31 = vld [vmem:[#allocation3 + $0x98] ss:$12 sps:$4 sm:$0xff]  }
  0x41   :  { %835 = vmatpush1.bf16.msra.mxu0 %v1924_v3  ;;  %v1943_v29 = vld [vmem:[#allocation6 + $0x70] sm:$0xff]   ;;  %v1965_v30 = vld [vmem:[#allocation3 + $0x80] ss:$12 sps:$4 sm:$0xff]   ;;  %v1945_v32 = vld [vmem:[#allocation6 + $0x78] sm:$0xff]  }
  0x42   :  { %836 = vmatprep.subr.bf16.mxu0 %v2146_v0  ;;  %1832 = vmatpush3.bf16.msra.mxu1 %v1934_v7  ;;  %v1947_v33 = vld [vmem:[#allocation3] ss:$12 sps:$4 sm:$0xff]   ;;  %v1951_v34 = vld [vmem:[#allocation3 + $0x1c] ss:$12 sps:$4 sm:$0xff]   ;;  %v1953_v37 = vld [vmem:[#allocation3 + $0x18] ss:$12 sps:$4 sm:$0xff]  }
  0x43   :  { %1833 = vmatprep.subr.bf16.mxu1 %v1936_v9  ;;  %v1973_v35 = vld [vmem:[#allocation3 + $0xb0] ss:$12 sps:$4 sm:$0xff]   ;;  %v1978_v36 = vld [vmem:[#allocation3 + $0xc8] ss:$12 sps:$4 sm:$0xff]   ;;  %v1979_v39 = vld [vmem:[#allocation3 + $0xe0] ss:$12 sps:$4 sm:$0xff]  }
  0x44   :  { %v1955_v38 = vld [vmem:[#allocation3 + $0x34] ss:$12 sps:$4 sm:$0xff]   ;;  %v1986_v40 = vld [vmem:[#allocation3 + $0xf8] ss:$12 sps:$4 sm:$0xff]   ;;  %v1958_v41 = vld [vmem:[#allocation3 + $0x30] ss:$12 sps:$4 sm:$0xff]  }
  0x45   :  { %837 = vmatpush1.bf16.msra.mxu0 %v1925_v5  ;;  %v1959_v42 = vld [vmem:[#allocation3 + $0x4c] ss:$12 sps:$4 sm:$0xff]   ;;  %v1989_v43 = vld [vmem:[#allocation3 + $0x110] ss:$12 sps:$4 sm:$0xff]   ;;  %v1994_v44 = vld [vmem:[#allocation3 + $0x128] ss:$12 sps:$4 sm:$0xff]  }
  0x46   :  { %838 = vmatprep.subr.bf16.mxu0 %v2146_v0  ;;  %1834 = vmatpush3.bf16.msra.mxu1 %v1936_v9  ;;  %v1961_v45 = vld [vmem:[#allocation3 + $0x48] ss:$12 sps:$4 sm:$0xff]   ;;  %v1963_v46 = vld [vmem:[#allocation3 + $0x64] ss:$12 sps:$4 sm:$0xff]   ;;  %v1997_v47 = vld [vmem:[#allocation3 + $0x140] ss:$12 sps:$4 sm:$0xff]  }
  0x47   :  { %1835 = vmatprep.subr.bf16.mxu1 %v1938_v11  ;;  %v2002_v48 = vld [vmem:[#allocation3 + $0x158] ss:$12 sps:$4 sm:$0xff]   ;;  %v1966_v49 = vld [vmem:[#allocation3 + $0x60] ss:$12 sps:$4 sm:$0xff]   ;;  %v1967_v50 = vld [vmem:[#allocation3 + $0x7c] ss:$12 sps:$4 sm:$0xff]  }
  0x48   :  { %v2005_v51 = vld [vmem:[#allocation3 + $0x170] ss:$12 sps:$4 sm:$0xff]   ;;  %v2013_v52 = vld [vmem:[#allocation3 + $0x188] ss:$12 sps:$4 sm:$0xff]   ;;  %v1969_v53 = vld [vmem:[#allocation3 + $0x78] ss:$12 sps:$4 sm:$0xff]  }
  0x49   :  { %839 = vmatpush1.bf16.msra.mxu0 %v1926_v8  ;;  %v1971_v54 = vld [vmem:[#allocation3 + $0x94] ss:$12 sps:$4 sm:$0xff]   ;;  %v2021_v56 = vld [vmem:[#allocation3 + $0x1b8] ss:$12 sps:$4 sm:$0xff]   ;;  %v1974_v57 = vld [vmem:[#allocation3 + $0x90] ss:$12 sps:$4 sm:$0xff]  }
  0x4a   :  { %840 = vmatprep.subr.bf16.mxu0 %v2146_v0  ;;  %1836 = vmatpush3.bf16.msra.mxu1 %v1938_v11  ;;  %v2014_v55 = vld [vmem:[#allocation3 + $0x1a0] ss:$12 sps:$4 sm:$0xff]   ;;  %v2022_v59 = vld [vmem:[#allocation3 + $0x1d0] ss:$12 sps:$4 sm:$0xff]   ;;  %v2029_v60 = vld [vmem:[#allocation3 + $0x1e8] ss:$12 sps:$4 sm:$0xff]  }
  0x4b   :  { %1837 = vmatprep.subr.bf16.mxu1 %v1940_v13  ;;  %v1975_v58 = vld [vmem:[#allocation3 + $0xac] ss:$12 sps:$4 sm:$0xff]   ;;  %v1977_v61 = vld [vmem:[#allocation3 + $0xa8] ss:$12 sps:$4 sm:$0xff]   ;;  %v1980_v62 = vld [vmem:[#allocation3 + $0xc4] ss:$12 sps:$4 sm:$0xff]  }
  0x4c   :  { %v2030_v63 = vld [vmem:[#allocation3 + $0x200] ss:$12 sps:$4 sm:$0xff]   ;;  %v1983_v2 = vld [vmem:[#allocation3 + $0xdc] ss:$12 sps:$4 sm:$0xff]   ;;  %v1985_v4 = vld [vmem:[#allocation3 + $0xd8] ss:$12 sps:$4 sm:$0xff]  }
  0x4d   :  { %841 = vmatpush1.bf16.msra.mxu0 %v1927_v10  ;;  %v1982_v1 = vld [vmem:[#allocation3 + $0xc0] ss:$12 sps:$4 sm:$0xff]   ;;  %v2038_v3 = vld [vmem:[#allocation3 + $0x230] ss:$12 sps:$4 sm:$0xff]   ;;  %v1993_v8 = vld [vmem:[#allocation3 + $0x108] ss:$12 sps:$4 sm:$0xff]  }
  0x4e   :  { %842 = vmatprep.subr.bf16.mxu0 %v2146_v0  ;;  %1838 = vmatpush3.bf16.msra.mxu1 %v1940_v13  ;;  %v1987_v5 = vld [vmem:[#allocation3 + $0xf4] ss:$12 sps:$4 sm:$0xff]   ;;  %v1990_v6 = vld [vmem:[#allocation3 + $0xf0] ss:$12 sps:$4 sm:$0xff]   ;;  %v1991_v7 = vld [vmem:[#allocation3 + $0x10c] ss:$12 sps:$4 sm:$0xff]  }
  0x4f   :  { %1839 = vmatprep.subr.bf16.mxu1 %v1942_v17  ;;  %v1995_v9 = vld [vmem:[#allocation3 + $0x124] ss:$12 sps:$4 sm:$0xff]   ;;  %v1998_v10 = vld [vmem:[#allocation3 + $0x120] ss:$12 sps:$4 sm:$0xff]   ;;  %v1999_v11 = vld [vmem:[#allocation3 + $0x13c] ss:$12 sps:$4 sm:$0xff]  }
  0x50   :  { %v2003_v13 = vld [vmem:[#allocation3 + $0x154] ss:$12 sps:$4 sm:$0xff]   ;;  %v2006_v14 = vld [vmem:[#allocation3 + $0x150] ss:$12 sps:$4 sm:$0xff]  }
  0x51   :  { %843 = vmatpush1.bf16.msra.mxu0 %v1928_v12  ;;  %v2001_v12 = vld [vmem:[#allocation3 + $0x138] ss:$12 sps:$4 sm:$0xff]   ;;  %v2009_v16 = vld [vmem:[#allocation3 + $0x168] ss:$12 sps:$4 sm:$0xff]  }
  0x52   :  { %844 = vmatprep.subr.bf16.mxu0 %v2146_v0  ;;  %1840 = vmatpush3.bf16.msra.mxu1 %v1942_v17  ;;  %v2010_v17 = vld [vmem:[#allocation3 + $0x184] ss:$12 sps:$4 sm:$0xff]  }
  0x53   :  { %1841 = vmatprep.subr.bf16.mxu1 %v1944_v19 }
  0x55   :  { %845 = vmatpush1.bf16.msra.mxu0 %v1929_v15  ;;  %v2007_v15 = vld [vmem:[#allocation3 + $0x16c] ss:$12 sps:$4 sm:$0xff]  }
  0x56   :  { %846 = vmatprep.subr.bf16.mxu0 %v2146_v0  ;;  %1842 = vmatpush3.bf16.msra.mxu1 %v1944_v19  ;;  %v2015_v19 = vld [vmem:[#allocation3 + $0x19c] ss:$12 sps:$4 sm:$0xff]  }
  0x59   :  { %847 = vmatpush1.bf16.msra.mxu0 %v1931_v18  ;;  %1844 = vmatmul.mubr.bf16.vlgmr.msra.gmra.mrb[0].mxu1 %v1950_v22  ;;  %v2012_v18 = vld [vmem:[#allocation3 + $0x180] ss:$12 sps:$4 sm:$0xff]   ;;  %v2020_v22 = vld [vmem:[#allocation3 + $0x1b0] ss:$12 sps:$4 sm:$0xff]  }
  0x5a   :  { %848 = vmatprep.subr.bf16.mxu0 %v2146_v0  ;;  %1847 = vmatprep.mubr.bf16.mxu1 %v1954_v23  ;;  %v2023_v23 = vld [vmem:[#allocation3 + $0x1cc] ss:$12 sps:$4 sm:$0xff]  }
  0x5d   :  { %849 = vmatpush1.bf16.msra.mxu0 %v1933_v20  ;;  %v2017_v20 = vld [vmem:[#allocation3 + $0x198] ss:$12 sps:$4 sm:$0xff]  }
  0x5e   :  { %850 = vmatprep.subr.bf16.mxu0 %v2146_v0 }
  0x61   :  { %851 = vmatpush1.bf16.msra.mxu0 %v1935_v21  ;;  %1848 = vmatmul.mubr.bf16.gmra.mrb[4].mxu1 %v1957_v26  ;;  %v2018_v21 = vld [vmem:[#allocation3 + $0x1b4] ss:$12 sps:$4 sm:$0xff]  }
  0x62   :  { %852 = vmatprep.subr.bf16.mxu0 %v2146_v0  ;;  %1851 = vmatprep.mubr.bf16.mxu1 %v1962_v27  ;;  %v2028_v26 = vld [vmem:[#allocation3 + $0x1e0] ss:$12 sps:$4 sm:$0xff]   ;;  %v2031_v27 = vld [vmem:[#allocation3 + $0x1fc] ss:$12 sps:$4 sm:$0xff]  }
  0x65   :  { %853 = vmatpush1.bf16.msra.mxu0 %v1937_v24  ;;  %v2025_v24 = vld [vmem:[#allocation3 + $0x1c8] ss:$12 sps:$4 sm:$0xff]  }
  0x66   :  { %854 = vmatprep.subr.bf16.mxu0 %v2146_v0 }
  0x69   :  { %855 = vmatpush1.bf16.msra.mxu0 %v1939_v25  ;;  %1852 = vmatmul.mubr.bf16.gmra.mrb[8].mxu1 %v1965_v30  ;;  %v2026_v25 = vld [vmem:[#allocation3 + $0x1e4] ss:$12 sps:$4 sm:$0xff]  }
  0x6a   :  { %856 = vmatprep.subr.bf16.mxu0 %v2146_v0  ;;  %1855 = vmatprep.mubr.bf16.mxu1 %v1970_v31  ;;  %v2036_v30 = vld [vmem:[#allocation3 + $0x210] ss:$12 sps:$4 sm:$0xff]   ;;  %v2039_v31 = vld [vmem:[#allocation3 + $0x22c] ss:$12 sps:$4 sm:$0xff]  }
  0x6d   :  { %857 = vmatpush1.bf16.msra.mxu0 %v1941_v28  ;;  %v2033_v28 = vld [vmem:[#allocation3 + $0x1f8] ss:$12 sps:$4 sm:$0xff]  }
  0x6e   :  { %858 = vmatprep.subr.bf16.mxu0 %v2146_v0 }
  0x71   :  { %859 = vmatpush1.bf16.msra.mxu0 %v1943_v29  ;;  %1856 = vmatmul.mubr.bf16.gmra.mrb[12].mxu1 %v1973_v35  ;;  %v2034_v29 = vld [vmem:[#allocation3 + $0x214] ss:$12 sps:$4 sm:$0xff]  }
  0x72   :  { %860 = vmatprep.subr.bf16.mxu0 %v2146_v0  ;;  %1859 = vmatprep.mubr.bf16.mxu1 %v1978_v36  ;;  %v2037_v0 = vld [vmem:[#allocation3 + $0x218] ss:$12 sps:$4 sm:$0xff]  }
  0x75   :  { %861 = vmatpush1.bf16.msra.mxu0 %v1945_v32  ;;  %v2041_v32 = vld [vmem:[#allocation3 + $0x228] ss:$12 sps:$4 sm:$0xff]  }
  0x78   :  { %863 = vmatmul.mubr.bf16.vlgmr.msra.gmra.mrb[0].mxu0 %v1947_v33 }
  0x79   :  { %870 = vmatprep.mubr.bf16.mxu0 %v1951_v34  ;;  %1860 = vmatmul.mubr.bf16.gmra.mrb[16].mxu1 %v1979_v39 }
  0x7a   :  { %1863 = vmatprep.mubr.bf16.mxu1 %v1986_v40 }
  0x80   :  { %871 = vmatmul.mubr.bf16.gmra.mrb[4].mxu0 %v1953_v37 }
  0x81   :  { %878 = vmatprep.mubr.bf16.mxu0 %v1955_v38  ;;  %1864 = vmatmul.mubr.bf16.gmra.mrb[20].mxu1 %v1989_v43 }
  0x82   :  { %1867 = vmatprep.mubr.bf16.mxu1 %v1994_v44 }
  0x88   :  { %879 = vmatmul.mubr.bf16.gmra.mrb[8].mxu0 %v1958_v41 }
  0x89   :  { %886 = vmatprep.mubr.bf16.mxu0 %v1959_v42  ;;  %1868 = vmatmul.mubr.bf16.gmra.mrb[24].mxu1 %v1997_v47 }
  0x8a   :  { %1871 = vmatprep.mubr.bf16.mxu1 %v2002_v48 }
  0x90   :  { %887 = vmatmul.mubr.bf16.gmra.mrb[12].mxu0 %v1961_v45 }
  0x91   :  { %894 = vmatprep.mubr.bf16.mxu0 %v1963_v46  ;;  %1872 = vmatmul.mubr.bf16.gmra.mrb[28].mxu1 %v2005_v51  ;;  %v2238_v46 = vld [vmem:[%s2453_s2] ss:$0 sm:$0xff]  ;;  %s2149_s2 = smov [#allocation9]  }
  0x92   :  { %1875 = vmatprep.mubr.bf16.mxu1 %v2013_v52  ;;  %s1654_s28 = sshll.u32 %s2149_s2, 4  ;;  %s1655_s28 = int_to_ptr.vmem [resolvable:$true] %s1654_s28 }
  0x93   :  { %s2111_s29 = scalar_lea.vmem %s1655_s28, 128  ;;  %p2116_p11 = scmp.lt.s32.totalorder %s1655_s28, %s1655_s28 }
  0x94   :  { %p2112_p10 = scmp.ne.s32.totalorder %s1655_s28, %s2111_s29  ;;  %p2117_p12 = scmp.lt.s32.totalorder %s2111_s29, %s2111_s29 }
  0x96   :  { %p2118_p13 = por %p2117_p12, %p2116_p11 }
  0x98   :  { %895 = vmatmul.mubr.bf16.gmra.mrb[16].mxu0 %v1966_v49  ;;  %p2119_p0 = pnand %p2118_p13, %p2112_p10 }
  0x99   :  { %902 = vmatprep.mubr.bf16.mxu0 %v1967_v50  ;;  %1876 = vmatmul.mubr.bf16.gmra.mrb[32].mxu1 %v2014_v55 }
  0x9a   :  { %1879 = vmatprep.mubr.bf16.mxu1 %v2021_v56 }
  0xa0   :  { %903 = vmatmul.mubr.bf16.gmra.mrb[20].mxu0 %v1969_v53 }
  0xa1   :  { %910 = vmatprep.mubr.bf16.mxu0 %v1971_v54  ;;  %1880 = vmatmul.mubr.bf16.gmra.mrb[36].mxu1 %v2022_v59 }
  0xa2   :  { %1883 = vmatprep.mubr.bf16.mxu1 %v2029_v60  ;;  %v2250_v60 = vld [vmem:[#allocation8] sm:$0xff] }
  0xa8   :  { %911 = vmatmul.mubr.bf16.gmra.mrb[24].mxu0 %v1974_v57 }
  0xa9   :  { %918 = vmatprep.mubr.bf16.mxu0 %v1975_v58  ;;  %1884 = vmatmul.mubr.bf16.gmra.mrb[40].mxu1 %v2030_v63 }
  0xaa   :  { %1887 = vmatprep.mubr.bf16.mxu1 %v2037_v0 }
  0xb0   :  { %919 = vmatmul.mubr.bf16.gmra.mrb[28].mxu0 %v1977_v61 }
  0xb1   :  { %926 = vmatprep.mubr.bf16.mxu0 %v1980_v62  ;;  %1888 = vmatmul.mubr.bf16.gmra.mrb[44].mxu1 %v2038_v3  ;;  %v1762_v62 = vcombine.high %v2250_v60, %v2250_v60 }
  0xb3   :  { %1599 = vmatprep.mubr.bf16.mxu1 %v1762_v62 }
  0xb8   :  { %927 = vmatmul.mubr.bf16.gmra.mrb[32].mxu0 %v1982_v1 }
  0xb9   :  { %934 = vmatprep.mubr.bf16.mxu0 %v1983_v2 }
  0xc0   :  { %935 = vmatmul.mubr.bf16.gmra.mrb[36].mxu0 %v1985_v4 }
  0xc1   :  { %942 = vmatprep.mubr.bf16.mxu0 %v1987_v5 }
  0xc8   :  { %943 = vmatmul.mubr.bf16.gmra.mrb[40].mxu0 %v1990_v6 }
  0xc9   :  { %950 = vmatprep.mubr.bf16.mxu0 %v1991_v7 }
  0xd0   :  { %951 = vmatmul.mubr.bf16.gmra.mrb[44].mxu0 %v1993_v8 }
  0xd1   :  { %958 = vmatprep.mubr.bf16.mxu0 %v1995_v9 }
  0xd8   :  { %959 = vmatmul.mubr.bf16.gmra.mrb[48].mxu0 %v1998_v10 }
  0xd9   :  { %966 = vmatprep.mubr.bf16.mxu0 %v1999_v11 }
  0xe0   :  { %967 = vmatmul.mubr.bf16.gmra.mrb[52].mxu0 %v2001_v12 }
  0xe1   :  { %974 = vmatprep.mubr.bf16.mxu0 %v2003_v13 }
  0xe8   :  { %975 = vmatmul.mubr.bf16.gmra.mrb[56].mxu0 %v2006_v14 }
  0xe9   :  { %982 = vmatprep.mubr.bf16.mxu0 %v2007_v15 }
  0xf0   :  { %983 = vmatmul.mubr.bf16.gmra.mrb[60].mxu0 %v2009_v16 }
  0xf1   :  { %990 = vmatprep.mubr.bf16.mxu0 %v2010_v17 }
  0xf8   :  { %991 = vmatmul.mubr.bf16.gmra.mrb[64].mxu0 %v2012_v18 }
  0xf9   :  { %998 = vmatprep.mubr.bf16.mxu0 %v2015_v19 }
 0x100   :  { %999 = vmatmul.mubr.bf16.gmra.mrb[68].mxu0 %v2017_v20 }
 0x101   :  { %1006 = vmatprep.mubr.bf16.mxu0 %v2018_v21 }
 0x108   :  { %1007 = vmatmul.mubr.bf16.gmra.mrb[72].mxu0 %v2020_v22 }
 0x109   :  { %1014 = vmatprep.mubr.bf16.mxu0 %v2023_v23 }
 0x110   :  { %1015 = vmatmul.mubr.bf16.gmra.mrb[76].mxu0 %v2025_v24 }
 0x111   :  { %1022 = vmatprep.mubr.bf16.mxu0 %v2026_v25 }
 0x118   :  { %1023 = vmatmul.mubr.bf16.gmra.mrb[80].mxu0 %v2028_v26 }
 0x119   :  { %1030 = vmatprep.mubr.bf16.mxu0 %v2031_v27 }
 0x120   :  { %1031 = vmatmul.mubr.bf16.gmra.mrb[84].mxu0 %v2033_v28 }
 0x121   :  { %1038 = vmatprep.mubr.bf16.mxu0 %v2034_v29 }
 0x128   :  { %1039 = vmatmul.mubr.bf16.gmra.mrb[88].mxu0 %v2036_v30 }
 0x129   :  { %1046 = vmatprep.mubr.bf16.mxu0 %v2039_v31 }
 0x12c   :  { %v1845_v33 = vpop.f32.mrb[0].mxu1 }
 0x12d   :  { %v1089_v34 = vpop.f32.mrb[1].mxu1 }
 0x12e   :  { %v1846_v35 = vpop.f32.mrb[2].mxu1 }
 0x12f   :  { %v1092_v36 = vpop.f32.mrb[3].mxu1 }
 0x130   :  { %1047 = vmatmul.mubr.bf16.gmra.mrb[92].mxu0 %v2041_v32 }
 0x134   :  { %v1849_v37 = vpop.f32.mrb[4].mxu1 }
 0x135   :  { %v1105_v38 = vpop.f32.mrb[5].mxu1 }
 0x136   :  { %v1850_v39 = vpop.f32.mrb[6].mxu1 }
 0x137   :  { %v1108_v40 = vpop.f32.mrb[7].mxu1 }
 0x13c   :  { %v2227_v41 = vpop.f32.mrb[8].mxu1 }
 0x13d   :  { %v2229_v42 = vpop.f32.mrb[9].mxu1 }
 0x13e   :  { %v2231_v43 = vpop.f32.mrb[10].mxu1 }
 0x13f   :  { %v2233_v44 = vpop.f32.mrb[11].mxu1 }
 0x144   :  { %v2240_v49 = vpop.f32.mrb[12].mxu1 }
 0x145   :  { %v2242_v51 = vpop.f32.mrb[13].mxu1 }
 0x146   :  { %v2245_v55 = vpop.f32.mrb[14].mxu1 }
 0x147   :  { %v2247_v56 = vpop.f32.mrb[15].mxu1 }
 0x14b   :  { %v864_v45 = vpop.f32.mrb[0].mxu0 }
 0x14c   :  { %v1090_v47 = vadd.f32 %v1089_v34, %v864_v45  ;;  %v866_v48 = vpop.f32.mrb[1].mxu0  ;;  %v2256_v2 = vpop.f32.mrb[16].mxu1 }
 0x14d   :  { %v867_v50 = vpop.f32.mrb[2].mxu0  ;;  %v2258_v4 = vpop.f32.mrb[17].mxu1 }
 0x14e   :  { %v1434_v52 = vadd.f32 %v2238_v46, %v1090_v47  ;;  %v1093_v53 = vadd.f32 %v1092_v36, %v867_v50  ;;  %v869_v54 = vpop.f32.mrb[3].mxu0  ;;  %v2261_v8 = vpop.f32.mrb[18].mxu1 }
 0x14f   :  { %v2263_v9 = vpop.f32.mrb[19].mxu1 }
 0x150   :  { %v1435_v57 = vadd.f32 %v2238_v46, %v1093_v53  ;;  %v1482_v58 = vmax.f32 %v1434_v52, 0.0 }
 0x152   :  { %v1483_v59 = vmax.f32 %v1435_v57, 0.0 }
 0x153   :  { %v872_v61 = vpop.f32.mrb[4].mxu0 }
 0x154   :  { %v2254_v63 = vpack.c.bf16 %v1483_v59, %v1482_v58  ;;  %v1098_v0 = vadd.f32 %v1845_v33, %v872_v61  ;;  %v874_v1 = vpop.f32.mrb[5].mxu0  ;;  %v2268_v17 = vpop.f32.mrb[20].mxu1 }
 0x155   :  { %v875_v3 = vpop.f32.mrb[6].mxu0  ;;  %v2270_v19 = vpop.f32.mrb[21].mxu1 }
 0x156   :  { %v1436_v5 = vadd.f32 %v2238_v46, %v1098_v0  ;;  %v1101_v6 = vadd.f32 %v1846_v35, %v875_v3  ;;  %v877_v7 = vpop.f32.mrb[7].mxu0  ;;  %v2273_v23 = vpop.f32.mrb[22].mxu1 }
 0x157   :  { %v2275_v24 = vpop.f32.mrb[23].mxu1 }
 0x158   :  { %v1437_v10 = vadd.f32 %v2238_v46, %v1101_v6  ;;  %v1484_v11 = vmax.f32 %v1436_v5, 0.0 }
 0x15a   :  { %v1485_v12 = vmax.f32 %v1437_v10, 0.0 }
 0x15b   :  { %v880_v13 = vpop.f32.mrb[8].mxu0 }
 0x15c   :  { %v2266_v14 = vpack.c.bf16 %v1485_v12, %v1484_v11  ;;  %v1106_v15 = vadd.f32 %v1105_v38, %v880_v13  ;;  %v882_v16 = vpop.f32.mrb[9].mxu0  ;;  %v2280_v32 = vpop.f32.mrb[24].mxu1 }
 0x15d   :  { %v883_v18 = vpop.f32.mrb[10].mxu0  ;;  %v2282_v34 = vpop.f32.mrb[25].mxu1 }
 0x15e   :  { %v1438_v20 = vadd.f32 %v2238_v46, %v1106_v15  ;;  %v1109_v21 = vadd.f32 %v1108_v40, %v883_v18  ;;  %v885_v22 = vpop.f32.mrb[11].mxu0  ;;  %v2285_v40 = vpop.f32.mrb[26].mxu1 }
 0x15f   :  { %v2287_v45 = vpop.f32.mrb[27].mxu1 }
 0x160   :  { %v1439_v25 = vadd.f32 %v2238_v46, %v1109_v21  ;;  %v1486_v26 = vmax.f32 %v1438_v20, 0.0 }
 0x162   :  { %v1487_v27 = vmax.f32 %v1439_v25, 0.0 }
 0x163   :  { %v888_v28 = vpop.f32.mrb[12].mxu0 }
 0x164   :  { %v2278_v29 = vpack.c.bf16 %v1487_v27, %v1486_v26  ;;  %v1114_v30 = vadd.f32 %v1849_v37, %v888_v28  ;;  %v890_v31 = vpop.f32.mrb[13].mxu0  ;;  %v2293_v57 = vpop.f32.mrb[28].mxu1 }
 0x165   :  { %v891_v33 = vpop.f32.mrb[14].mxu0  ;;  %v2295_v59 = vpop.f32.mrb[29].mxu1 }
 0x166   :  { %v1440_v35 = vadd.f32 %v2238_v46, %v1114_v30  ;;  %v1117_v36 = vadd.f32 %v1850_v39, %v891_v33  ;;  %v893_v38 = vpop.f32.mrb[15].mxu0  ;;  %v2299_v0 = vpop.f32.mrb[30].mxu1 }
 0x167   :  { %v2301_v1 = vpop.f32.mrb[31].mxu1 }
 0x168   :  { %v1441_v47 = vadd.f32 %v2238_v46, %v1117_v36  ;;  %v1488_v48 = vmax.f32 %v1440_v35, 0.0 }
 0x16a   :  { %v1489_v50 = vmax.f32 %v1441_v47, 0.0 }
 0x16b   :  { %v896_v52 = vpop.f32.mrb[16].mxu0 }
 0x16c   :  { %v2290_v37 = vpack.c.bf16 %v1489_v50, %v1488_v48  ;;  %v1122_v53 = vadd.f32 %v2229_v42, %v896_v52  ;;  %v898_v54 = vpop.f32.mrb[17].mxu0  ;;  %v2307_v12 = vpop.f32.mrb[32].mxu1 }
 0x16d   :  { %v899_v58 = vpop.f32.mrb[18].mxu0  ;;  %v2309_v15 = vpop.f32.mrb[33].mxu1 }
 0x16e   :  { %v1442_v39 = vadd.f32 %v2238_v46, %v1122_v53  ;;  %v1125_v61 = vadd.f32 %v2233_v44, %v899_v58  ;;  %v901_v62 = vpop.f32.mrb[19].mxu0  ;;  %v2313_v20 = vpop.f32.mrb[34].mxu1 }
 0x16f   :  { %v2315_v21 = vpop.f32.mrb[35].mxu1 }
 0x170   :  { %v1443_v3 = vadd.f32 %v2238_v46, %v1125_v61  ;;  %v1490_v5 = vmax.f32 %v1442_v39, 0.0 }
 0x172   :  { %v1491_v6 = vmax.f32 %v1443_v3, 0.0 }
 0x173   :  { %v904_v42 = vpop.f32.mrb[20].mxu0 }
 0x174   :  { %v2304_v7 = vpack.c.bf16 %v1491_v6, %v1490_v5  ;;  %v1130_v10 = vadd.f32 %v2227_v41, %v904_v42  ;;  %v906_v11 = vpop.f32.mrb[21].mxu0  ;;  %v2321_v31 = vpop.f32.mrb[36].mxu1 }
 0x175   :  { %v907_v13 = vpop.f32.mrb[22].mxu0  ;;  %v2323_v35 = vpop.f32.mrb[37].mxu1 }
 0x176   :  { %v1444_v44 = vadd.f32 %v2238_v46, %v1130_v10  ;;  %v1133_v16 = vadd.f32 %v2231_v43, %v907_v13  ;;  %v909_v18 = vpop.f32.mrb[23].mxu0  ;;  %v2327_v47 = vpop.f32.mrb[38].mxu1 }
 0x177   :  { %v2329_v48 = vpop.f32.mrb[39].mxu1 }
 0x178   :  { %v1445_v22 = vadd.f32 %v2238_v46, %v1133_v16  ;;  %v1492_v25 = vmax.f32 %v1444_v44, 0.0 }
 0x17a   :  { %v1493_v26 = vmax.f32 %v1445_v22, 0.0 }
 0x17b   :  { %v912_v41 = vpop.f32.mrb[24].mxu0 }
 0x17c   :  { %v2318_v27 = vpack.c.bf16 %v1493_v26, %v1492_v25  ;;  %v1138_v28 = vadd.f32 %v2242_v51, %v912_v41  ;;  %v914_v30 = vpop.f32.mrb[25].mxu0  ;;  %v2335_v61 = vpop.f32.mrb[40].mxu1 }
 0x17d   :  { %v915_v33 = vpop.f32.mrb[26].mxu0  ;;  %v2337_v3 = vpop.f32.mrb[41].mxu1 }
 0x17e   :  { %v1446_v43 = vadd.f32 %v2238_v46, %v1138_v28  ;;  %v1141_v36 = vadd.f32 %v2247_v56, %v915_v33  ;;  %v917_v38 = vpop.f32.mrb[27].mxu0  ;;  %v2341_v42 = vpop.f32.mrb[42].mxu1 }
 0x17f   :  { %v2343_v10 = vpop.f32.mrb[43].mxu1 }
 0x180   :  { %v1447_v50 = vadd.f32 %v2238_v46, %v1141_v36  ;;  %v1494_v52 = vmax.f32 %v1446_v43, 0.0 }
 0x182   :  { %v1495_v53 = vmax.f32 %v1447_v50, 0.0 }
 0x183   :  { %v920_v51 = vpop.f32.mrb[28].mxu0 }
 0x184   :  { %v2332_v54 = vpack.c.bf16 %v1495_v53, %v1494_v52  ;;  %v1146_v58 = vadd.f32 %v2240_v49, %v920_v51  ;;  %v922_v39 = vpop.f32.mrb[29].mxu0  ;;  %v2349_v25 = vpop.f32.mrb[44].mxu1 }
 0x185   :  { %v923_v62 = vpop.f32.mrb[30].mxu0  ;;  %v2351_v41 = vpop.f32.mrb[45].mxu1 }
 0x186   :  { %v1448_v56 = vadd.f32 %v2238_v46, %v1146_v58  ;;  %v1149_v5 = vadd.f32 %v2245_v55, %v923_v62  ;;  %v925_v6 = vpop.f32.mrb[31].mxu0  ;;  %v2355_v33 = vpop.f32.mrb[46].mxu1 }
 0x187   :  { %v2357_v43 = vpop.f32.mrb[47].mxu1 }
 0x188   :  { %v1449_v11 = vadd.f32 %v2238_v46, %v1149_v5  ;;  %v1496_v13 = vmax.f32 %v1448_v56, 0.0 }
 0x18a   :  { %v1497_v44 = vmax.f32 %v1449_v11, 0.0 }
 0x18b   :  { %v928_v49 = vpop.f32.mrb[32].mxu0 }
 0x18c   :  { %v2346_v16 = vpack.c.bf16 %v1497_v44, %v1496_v13  ;;  %v1154_v18 = vadd.f32 %v2258_v4, %v928_v49  ;;  %v930_v22 = vpop.f32.mrb[33].mxu0 }
 0x18d   :  { %v931_v26 = vpop.f32.mrb[34].mxu0 }
 0x18e   :  { %v1450_v55 = vadd.f32 %v2238_v46, %v1154_v18  ;;  %v1157_v28 = vadd.f32 %v2263_v9, %v931_v26  ;;  %v933_v30 = vpop.f32.mrb[35].mxu0 }
 0x190   :  { %v1451_v36 = vadd.f32 %v2238_v46, %v1157_v28  ;;  %v1498_v38 = vmax.f32 %v1450_v55, 0.0 }
 0x192   :  { %v1499_v50 = vmax.f32 %v1451_v36, 0.0 }
 0x193   :  { %v936_v4 = vpop.f32.mrb[36].mxu0 }
 0x194   :  { %v1162_v52 = vadd.f32 %v2256_v2, %v936_v4  ;;  %v938_v53 = vpop.f32.mrb[37].mxu0  ;;  %v1540_v51 = vpack.c.bf16 %v1499_v50, %v1498_v38 }
 0x195   :  { %v939_v58 = vpop.f32.mrb[38].mxu0 }
 0x196   :  { %v1452_v39 = vadd.f32 %v2238_v46, %v1162_v52  ;;  %v1165_v62 = vadd.f32 %v2261_v8, %v939_v58  ;;  %1796 = vmatprep.subr.bf16.mxu1 %v1540_v51  ;;  %v941_v9 = vpop.f32.mrb[39].mxu0 }
 0x197   :  { %1797 = vmatpush3.bf16.msra.mxu1 %v2254_v63 }
 0x198   :  { %v1453_v56 = vadd.f32 %v2238_v46, %v1165_v62  ;;  %v1500_v5 = vmax.f32 %v1452_v39, 0.0 }
 0x19a   :  { %v1501_v6 = vmax.f32 %v1453_v56, 0.0 }
 0x19b   :  { %v944_v11 = vpop.f32.mrb[40].mxu0 }
 0x19c   :  { %v1170_v13 = vadd.f32 %v2270_v19, %v944_v11  ;;  %v946_v44 = vpop.f32.mrb[41].mxu0  ;;  %v1541_v2 = vpack.c.bf16 %v1501_v6, %v1500_v5 }
 0x19d   :  { %v947_v49 = vpop.f32.mrb[42].mxu0 }
 0x19e   :  { %v1454_v18 = vadd.f32 %v2238_v46, %v1170_v13  ;;  %v1173_v22 = vadd.f32 %v2275_v24, %v947_v49  ;;  %1798 = vmatprep.subr.bf16.mxu1 %v1541_v2  ;;  %v949_v8 = vpop.f32.mrb[43].mxu0 }
 0x19f   :  { %1799 = vmatpush3.bf16.msra.mxu1 %v2266_v14 }
 0x1a0   :  { %v1455_v63 = vadd.f32 %v2238_v46, %v1173_v22  ;;  %v1502_v26 = vmax.f32 %v1454_v18, 0.0 }
 0x1a2   :  { %v1503_v55 = vmax.f32 %v1455_v63, 0.0 }
 0x1a3   :  { %v952_v28 = vpop.f32.mrb[44].mxu0 }
 0x1a4   :  { %v1178_v30 = vadd.f32 %v2268_v17, %v952_v28  ;;  %v954_v36 = vpop.f32.mrb[45].mxu0  ;;  %v1542_v19 = vpack.c.bf16 %v1503_v55, %v1502_v26 }
 0x1a5   :  { %v955_v38 = vpop.f32.mrb[46].mxu0 }
 0x1a6   :  { %v1456_v50 = vadd.f32 %v2238_v46, %v1178_v30  ;;  %v1181_v4 = vadd.f32 %v2273_v23, %v955_v38  ;;  %1800 = vmatprep.subr.bf16.mxu1 %v1542_v19  ;;  %v957_v24 = vpop.f32.mrb[47].mxu0 }
 0x1a7   :  { %1801 = vmatpush3.bf16.msra.mxu1 %v2278_v29 }
 0x1a8   :  { %v1457_v14 = vadd.f32 %v2238_v46, %v1181_v4  ;;  %v1504_v52 = vmax.f32 %v1456_v50, 0.0 }
 0x1aa   :  { %v1505_v53 = vmax.f32 %v1457_v14, 0.0 }
 0x1ab   :  { %v960_v51 = vpop.f32.mrb[48].mxu0 }
 0x1ac   :  { %v1186_v58 = vadd.f32 %v2282_v34, %v960_v51  ;;  %v962_v39 = vpop.f32.mrb[49].mxu0  ;;  %v1543_v17 = vpack.c.bf16 %v1505_v53, %v1504_v52 }
 0x1ad   :  { %v963_v62 = vpop.f32.mrb[50].mxu0 }
 0x1ae   :  { %v1458_v9 = vadd.f32 %v2238_v46, %v1186_v58  ;;  %v1189_v56 = vadd.f32 %v2287_v45, %v963_v62  ;;  %1802 = vmatprep.subr.bf16.mxu1 %v1543_v17  ;;  %v965_v23 = vpop.f32.mrb[51].mxu0 }
 0x1af   :  { %1803 = vmatpush3.bf16.msra.mxu1 %v2290_v37 }
 0x1b0   :  { %v1459_v29 = vadd.f32 %v2238_v46, %v1189_v56  ;;  %v1506_v5 = vmax.f32 %v1458_v9, 0.0 }
 0x1b2   :  { %v1507_v6 = vmax.f32 %v1459_v29, 0.0  ;;  %v1761_v29 = vcombine.low %v2250_v60, %v2250_v60 }
 0x1b3   :  { %v968_v11 = vpop.f32.mrb[52].mxu0 }
 0x1b4   :  { %v1194_v13 = vadd.f32 %v2280_v32, %v968_v11  ;;  %v970_v44 = vpop.f32.mrb[53].mxu0  ;;  %v1544_v34 = vpack.c.bf16 %v1507_v6, %v1506_v5  ;;  %v2147_v5 = vmov 0.0  }
 0x1b5   :  { %v971_v2 = vpop.f32.mrb[54].mxu0 }
 0x1b6   :  { %v1460_v49 = vadd.f32 %v2238_v46, %v1194_v13  ;;  %v1197_v18 = vadd.f32 %v2285_v40, %v971_v2  ;;  %1804 = vmatprep.subr.bf16.mxu1 %v1544_v34  ;;  %v973_v45 = vpop.f32.mrb[55].mxu0 }
 0x1b7   :  { %1805 = vmatpush3.bf16.msra.mxu1 %v2304_v7 }
 0x1b8   :  { %v1461_v37 = vadd.f32 %v2238_v46, %v1197_v18  ;;  %v1508_v22 = vmax.f32 %v1460_v49, 0.0 }
 0x1ba   :  { %v1509_v8 = vmax.f32 %v1461_v37, 0.0 }
 0x1bb   :  { %v976_v63 = vpop.f32.mrb[56].mxu0 }
 0x1bc   :  { %v1202_v26 = vadd.f32 %v2295_v59, %v976_v63  ;;  %v978_v55 = vpop.f32.mrb[57].mxu0  ;;  %v1545_v32 = vpack.c.bf16 %v1509_v8, %v1508_v22 }
 0x1bd   :  { %v979_v28 = vpop.f32.mrb[58].mxu0 }
 0x1be   :  { %v1462_v30 = vadd.f32 %v2238_v46, %v1202_v26  ;;  %v1205_v36 = vadd.f32 %v2301_v1, %v979_v28  ;;  %1806 = vmatprep.subr.bf16.mxu1 %v1545_v32  ;;  %v981_v40 = vpop.f32.mrb[59].mxu0 }
 0x1bf   :  { %1807 = vmatpush3.bf16.msra.mxu1 %v2318_v27 }
 0x1c0   :  { %v1463_v7 = vadd.f32 %v2238_v46, %v1205_v36  ;;  %v1510_v19 = vmax.f32 %v1462_v30, 0.0 }
 0x1c2   :  { %v1511_v38 = vmax.f32 %v1463_v7, 0.0 }
 0x1c3   :  { %v984_v50 = vpop.f32.mrb[60].mxu0 }
 0x1c4   :  { %v1210_v4 = vadd.f32 %v2293_v57, %v984_v50  ;;  %v986_v24 = vpop.f32.mrb[61].mxu0  ;;  %v1546_v59 = vpack.c.bf16 %v1511_v38, %v1510_v19 }
 0x1c5   :  { %v987_v14 = vpop.f32.mrb[62].mxu0 }
 0x1c6   :  { %v1464_v52 = vadd.f32 %v2238_v46, %v1210_v4  ;;  %v1213_v53 = vadd.f32 %v2299_v0, %v987_v14  ;;  %1808 = vmatprep.subr.bf16.mxu1 %v1546_v59  ;;  %v989_v1 = vpop.f32.mrb[63].mxu0 }
 0x1c7   :  { %1809 = vmatpush3.bf16.msra.mxu1 %v2332_v54 }
 0x1c8   :  { %v1465_v27 = vadd.f32 %v2238_v46, %v1213_v53  ;;  %v1512_v51 = vmax.f32 %v1464_v52, 0.0 }
 0x1ca   :  { %v1513_v58 = vmax.f32 %v1465_v27, 0.0 }
 0x1cb   :  { %v992_v39 = vpop.f32.mrb[64].mxu0 }
 0x1cc   :  { %v994_v17 = vpop.f32.mrb[65].mxu0  ;;  %v1218_v62 = vadd.f32 %v2309_v15, %v992_v39  ;;  %v1547_v57 = vpack.c.bf16 %v1513_v58, %v1512_v51 }
 0x1cd   :  { %v995_v9 = vpop.f32.mrb[66].mxu0 }
 0x1ce   :  { %v1466_v56 = vadd.f32 %v2238_v46, %v1218_v62  ;;  %1810 = vmatprep.subr.bf16.mxu1 %v1547_v57  ;;  %v997_v23 = vpop.f32.mrb[67].mxu0  ;;  %v1221_v0 = vadd.f32 %v2315_v21, %v995_v9 }
 0x1cf   :  { %1811 = vmatpush3.bf16.msra.mxu1 %v2346_v16 }
 0x1d0   :  { %v1467_v54 = vadd.f32 %v2238_v46, %v1221_v0  ;;  %1891 = vmatprep.subr.bf16.mxu1 %v2147_v5  ;;  %v1514_v6 = vmax.f32 %v1466_v56, 0.0 }
 0x1d2   :  { %v1515_v15 = vmax.f32 %v1467_v54, 0.0  ;;  %1600 = vmatmul.mubr.bf16.vlgmr.msra.gmra.mrb[48].mxu1 %v1761_v29 }
 0x1d3   :  { %v1000_v11 = vpop.f32.mrb[68].mxu0  ;;  %1907 = vmatprep.mubr.msk.bf16.mxu1 %vm2148_vm0, %v2147_v5 }
 0x1d4   :  { %v1548_v13 = vpack.c.bf16 %v1515_v15, %v1514_v6  ;;  %v1226_v21 = vadd.f32 %v2307_v12, %v1000_v11  ;;  %v1002_v44 = vpop.f32.mrb[69].mxu0 }
 0x1d5   :  { %v1003_v34 = vpop.f32.mrb[70].mxu0 }
 0x1d6   :  { %v1468_v60 = vadd.f32 %v2238_v46, %v1226_v21  ;;  %v1229_v16 = vadd.f32 %v2313_v20, %v1003_v34  ;;  %v1005_v2 = vpop.f32.mrb[71].mxu0  ;;  %1892 = vmatpush3.bf16.msra.mxu1 %v1548_v13 }
 0x1d7   :  { %1893 = vmatprep.subr.bf16.mxu1 %v2147_v5 }
 0x1d8   :  { %v1469_v49 = vadd.f32 %v2238_v46, %v1229_v16  ;;  %v1516_v18 = vmax.f32 %v1468_v60, 0.0 }
 0x1da   :  { %v1517_v45 = vmax.f32 %v1469_v49, 0.0 }
 0x1db   :  { %v1008_v37 = vpop.f32.mrb[72].mxu0 }
 0x1dc   :  { %v1549_v22 = vpack.c.bf16 %v1517_v45, %v1516_v18  ;;  %v1010_v8 = vpop.f32.mrb[73].mxu0  ;;  %v1234_v63 = vadd.f32 %v2323_v35, %v1008_v37 }
 0x1dd   :  { %v1011_v12 = vpop.f32.mrb[74].mxu0 }
 0x1de   :  { %v1470_v26 = vadd.f32 %v2238_v46, %v1234_v63  ;;  %v1013_v55 = vpop.f32.mrb[75].mxu0  ;;  %v1237_v32 = vadd.f32 %v2329_v48, %v1011_v12  ;;  %1894 = vmatpush3.bf16.msra.mxu1 %v1549_v22 }
 0x1df   :  { %1895 = vmatprep.subr.bf16.mxu1 %v2147_v5 }
 0x1e0   :  { %v1471_v20 = vadd.f32 %v2238_v46, %v1237_v32  ;;  %v1518_v28 = vmax.f32 %v1470_v26, 0.0  ;;  %v2044_v32 = vld [vmem:[#allocation8 + $0x8] ss:$0 sps:$4 sm:$0xff]  }
 0x1e2   :  { %v1519_v30 = vmax.f32 %v1471_v20, 0.0 }
 0x1e3   :  { %v1016_v36 = vpop.f32.mrb[76].mxu0 }
 0x1e4   :  { %v1550_v40 = vpack.c.bf16 %v1519_v30, %v1518_v28  ;;  %v1242_v7 = vadd.f32 %v2321_v31, %v1016_v36  ;;  %v1018_v19 = vpop.f32.mrb[77].mxu0 }
 0x1e5   :  { %v1019_v38 = vpop.f32.mrb[78].mxu0 }
 0x1e6   :  { %v1472_v35 = vadd.f32 %v2238_v46, %v1242_v7  ;;  %v1245_v50 = vadd.f32 %v2327_v47, %v1019_v38  ;;  %v1021_v4 = vpop.f32.mrb[79].mxu0  ;;  %1896 = vmatpush3.bf16.msra.mxu1 %v1550_v40 }
 0x1e7   :  { %1897 = vmatprep.subr.bf16.mxu1 %v2147_v5 }
 0x1e8   :  { %v1473_v48 = vadd.f32 %v2238_v46, %v1245_v50  ;;  %v1520_v24 = vmax.f32 %v1472_v35, 0.0 }
 0x1ea   :  { %v1521_v59 = vmax.f32 %v1473_v48, 0.0 }
 0x1eb   :  { %v1024_v14 = vpop.f32.mrb[80].mxu0 }
 0x1ec   :  { %v1551_v52 = vpack.c.bf16 %v1521_v59, %v1520_v24  ;;  %v1026_v53 = vpop.f32.mrb[81].mxu0  ;;  %v1250_v1 = vadd.f32 %v2337_v3, %v1024_v14 }
 0x1ed   :  { %v1027_v31 = vpop.f32.mrb[82].mxu0 }
 0x1ee   :  { %v1474_v27 = vadd.f32 %v2238_v46, %v1250_v1  ;;  %v1029_v51 = vpop.f32.mrb[83].mxu0  ;;  %v1253_v58 = vadd.f32 %v2343_v10, %v1027_v31  ;;  %1898 = vmatpush3.bf16.msra.mxu1 %v1551_v52 }
 0x1ef   :  { %1899 = vmatprep.subr.bf16.mxu1 %v2147_v5 }
 0x1f0   :  { %v1475_v47 = vadd.f32 %v2238_v46, %v1253_v58  ;;  %v1522_v39 = vmax.f32 %v1474_v27, 0.0 }
 0x1f2   :  { %v1523_v17 = vmax.f32 %v1475_v47, 0.0 }
 0x1f3   :  { %v1032_v62 = vpop.f32.mrb[84].mxu0 }
 0x1f4   :  { %v1552_v57 = vpack.c.bf16 %v1523_v17, %v1522_v39  ;;  %v1258_v9 = vadd.f32 %v2335_v61, %v1032_v62  ;;  %v1034_v56 = vpop.f32.mrb[85].mxu0 }
 0x1f5   :  { %v1035_v23 = vpop.f32.mrb[86].mxu0 }
 0x1f6   :  { %v1476_v3 = vadd.f32 %v2238_v46, %v1258_v9  ;;  %v1261_v0 = vadd.f32 %v2341_v42, %v1035_v23  ;;  %v1037_v29 = vpop.f32.mrb[87].mxu0  ;;  %1900 = vmatpush3.bf16.msra.mxu1 %v1552_v57 }
 0x1f7   :  { %1901 = vmatprep.subr.bf16.mxu1 %v2147_v5 }
 0x1f8   :  { %v1477_v10 = vadd.f32 %v2238_v46, %v1261_v0  ;;  %v1524_v54 = vmax.f32 %v1476_v3, 0.0 }
 0x1fa   :  { %v1525_v6 = vmax.f32 %v1477_v10, 0.0 }
 0x1fb   :  { %v1040_v15 = vpop.f32.mrb[88].mxu0 }
 0x1fc   :  { %v1553_v11 = vpack.c.bf16 %v1525_v6, %v1524_v54  ;;  %v1042_v13 = vpop.f32.mrb[89].mxu0  ;;  %v1266_v21 = vadd.f32 %v2351_v41, %v1040_v15 }
 0x1fd   :  { %v1043_v61 = vpop.f32.mrb[90].mxu0 }
 0x1fe   :  { %v1478_v44 = vadd.f32 %v2238_v46, %v1266_v21  ;;  %v1045_v34 = vpop.f32.mrb[91].mxu0  ;;  %v1269_v60 = vadd.f32 %v2357_v43, %v1043_v61  ;;  %1902 = vmatpush3.bf16.msra.mxu1 %v1553_v11 }
 0x1ff   :  { %1903 = vmatprep.subr.bf16.mxu1 %v2147_v5 }
 0x200   :  { %v1479_v42 = vadd.f32 %v2238_v46, %v1269_v60  ;;  %v1526_v16 = vmax.f32 %v1478_v44, 0.0 }
 0x202   :  { %v1527_v2 = vmax.f32 %v1479_v42, 0.0 }
 0x203   :  { %v1048_v49 = vpop.f32.mrb[92].mxu0 }
 0x204   :  { %v1554_v18 = vpack.c.bf16 %v1527_v2, %v1526_v16  ;;  %v1274_v45 = vadd.f32 %v2349_v25, %v1048_v49  ;;  %v1050_v37 = vpop.f32.mrb[93].mxu0 }
 0x205   :  { %v1051_v22 = vpop.f32.mrb[94].mxu0 }
 0x206   :  { %v1480_v41 = vadd.f32 %v2238_v46, %v1274_v45  ;;  %v1277_v8 = vadd.f32 %v2355_v33, %v1051_v22  ;;  %v1053_v63 = vpop.f32.mrb[95].mxu0  ;;  %1904 = vmatpush3.bf16.msra.mxu1 %v1554_v18 }
 0x207   :  { %1905 = vmatprep.subr.bf16.mxu1 %v2147_v5 }
 0x208   :  { %v1481_v43 = vadd.f32 %v2238_v46, %v1277_v8  ;;  %v1528_v12 = vmax.f32 %v1480_v41, 0.0 }
 0x20a   :  { %v1529_v26 = vmax.f32 %v1481_v43, 0.0 }
 0x20c   :  { %v1555_v55 = vpack.c.bf16 %v1529_v26, %v1528_v12 }
 0x20e   :  { %1906 = vmatpush3.bf16.msra.mxu1 %v1555_v55 }
 0x211   :  { %1908 = vmatmul.mubr.bf16.vlgmr.msra.gmra.mrb[52].mxu1 %v2044_v32 }
 0x2a5   :  { %v1812_v20 = vpop.f32.mrb[48].mxu1 }
 0x2a6   :  { %v1813_v25 = vpop.f32.mrb[49].mxu1 }
 0x2a7   :  { %v1814_v28 = vadd.f32 %v1813_v25, %v1812_v20  ;;  %v1815_v30 = vpop.f32.mrb[50].mxu1 }
 0x2a8   :  { %v1816_v36 = vpop.f32.mrb[51].mxu1 }
 0x2e4   :  { %v1641_v33 = vpop.f32.mrb[52].mxu1 }
 0x2e5   :  { %v1642_v40 = vadd.f32 %v1814_v28, %v1641_v33  ;;  %v1909_v7 = vpop.f32.mrb[53].mxu1 }
 0x2e6   :  { %v1644_v5 = vpop.f32.mrb[54].mxu1 }
 0x2e7   :  { %1647 = vst [vmem:[#allocation9] sm:$0xff] %v1642_v40  ;;  %v1910_v46 = vpop.f32.mrb[55].mxu1 }
 0x2e8   :  { %2122 = shalt.err (!%p2119_p0)
}
 0x2e9   :  { %s2123_s6 = scalar_lea.hbm %s2455_s4, 128 }
 0x2ea   :  { %p2124_p1 = scmp.ne.s32.totalorder %s2455_s4, %s2123_s6  ;;  %p2127_p2 = scmp.lt.u32.totalorder %s2123_s6, %s2455_s4 }
 0x2ec   :  { %p2129_p3 = pnand %p2127_p2, %p2124_p1 }
 0x2ee   :  { %2132 = shalt.err (!%p2129_p3)
}
 0x2ef   :  { %1657 = dma.vmem_to_hbm [thread:$0]  %s1655_s28, 128, %s2455_s4, [#allocation5]  }
 0x2f0   :  { %2137 = dma.done.wait [#allocation5], 128  }
 0x2f1   :  { %2138 = vsyncadd [#allocation5], 4294967168 }
 0x2f2   :  { %1661 = vsyncpa [#allocation4], 1 }
 0x2f3   :  { %1662 = vsyncpa [#allocation7], 1 }
 0x2f4   :  { %1663 = vsyncpa [#allocation5], 1 }

</bundles_post_ra>
